<compile_context>
chip_gen: v7x
topology: tpu7x:2x2x1
jax: 0.10.0
libtpu: 0.0.40
codegen_flags: <defaults>
</compile_context>

<pallas_src>
import functools

import jax
import jax.numpy as jnp
from jax.experimental import pallas as pl
from jax.experimental.pallas import tpu as pltpu


def _round_up(x, m):
    return (x + m - 1) // m * m


def _choose_nk_tiles(code_size, voc_size):
    """Static (N, K) tile sizes -- shared by init-time weight prep and the
    jitted forward so padded shapes always agree."""
    tn = min(512, _round_up(code_size, 128))    # lane-dense output tile
    tk = min(2048, _round_up(voc_size, 128))    # large K tile: fewer acc RMW steps
    return tn, tk


def _vmem_limit_bytes():
    """Generation-aware VMEM limit: ~3/4 of physical, capped for headroom."""
    cap = 64 * 1024 * 1024                      # conservative fallback (v7x per-TC)
    try:
        cap = int(pltpu.get_tpu_info().vmem_capacity_bytes)
    except Exception:
        pass
    return int(min(cap * 3 // 4, 100 * 1024 * 1024))


def _linear_kernel(x_ref, w_ref, b_ref, o_ref, acc_ref):
    # x_ref:   (tm, tk) bf16  activation tile
    # w_ref:   (tk, tn) bf16  weight tile, pre-transposed (K, N) layout
    # b_ref:   (1,  tn) f32   bias tile (keyed on N only)
    # o_ref:   (tm, tn)       output tile
    # acc_ref: (tm, tn) f32   accumulator scratch (persists across K)
    k = pl.program_id(2)

    @pl.when(k == 0)
    def _():
        acc_ref[...] = jnp.zeros_like(acc_ref)

    acc_ref[...] += jnp.dot(x_ref[...], w_ref[...],
                            preferred_element_type=jnp.float32)

    @pl.when(k == pl.num_programs(2) - 1)
    def _():
        o_ref[...] = (acc_ref[...] + b_ref[...]).astype(o_ref.dtype)


@functools.partial(jax.jit, static_argnames=("code_size",))
def out2code_forward(opd, w_kn, bias_row, *, code_size):
    """Equivalent of Out2Code.forward: nn.Linear(voc_size, code_size)(opd).

    opd:      (..., voc_size)
    w_kn:     (k_pad, n_pad) bf16  -- from prepare_out2code_params
    bias_row: (1, n_pad) f32       -- from prepare_out2code_params
    returns   (..., code_size) in opd.dtype
    """
    voc_size = opd.shape[-1]
    lead = opd.shape[:-1]
    tn, tk = _choose_nk_tiles(code_size, voc_size)

    k_pad, n_pad = w_kn.shape
    assert k_pad == _round_up(voc_size, tk) and n_pad == _round_up(code_size, tn), (
        "weight/bias must be packed with prepare_out2code_params for these shapes")

    x = opd.reshape(-1, voc_size).astype(jnp.bfloat16)   # bf16 operands, f32 acc
    m = x.shape[0]

    tm = min(512, _round_up(m, 16))                       # bf16: 2 rows / sublane
    # v7x has 2 TensorCores: expose >= 2 parallel (i, j) tiles when M allows it.
    if pl.cdiv(m, tm) * (n_pad // tn) < 2 and tm >= 32:
        tm = _round_up(tm // 2, 16)
    m_pad = _round_up(m, tm)

    if (m_pad, k_pad) != (m, voc_size):                   # cheap activation pad only
        x = jnp.pad(x, ((0, m_pad - m), (0, k_pad - voc_size)))

    grid = (m_pad // tm, n_pad // tn, k_pad // tk)
    gi, gj, _ = grid

    x_bytes = m_pad * k_pad * jnp.dtype(x.dtype).itemsize * gj       # re-read per N tile
    w_bytes = k_pad * n_pad * jnp.dtype(w_kn.dtype).itemsize * gi    # re-read per M tile
    b_bytes = n_pad * jnp.dtype(bias_row.dtype).itemsize * gi
    o_bytes = m_pad * n_pad * jnp.dtype(opd.dtype).itemsize
    cost = pl.CostEstimate(
        flops=2 * m_pad * n_pad * k_pad,
        transcendentals=0,
        bytes_accessed=x_bytes + w_bytes + b_bytes + o_bytes,
    )

    out = pl.pallas_call(
        _linear_kernel,
        out_shape=jax.ShapeDtypeStruct((m_pad, n_pad), opd.dtype),
        grid_spec=pltpu.PrefetchScalarGridSpec(
            num_scalar_prefetch=0,
            grid=grid,
            in_specs=[
                pl.BlockSpec((tm, tk), lambda i, j, k: (i, k)),   # x   (bf16)
                pl.BlockSpec((tk, tn), lambda i, j, k: (k, j)),   # w   (K, N) bf16
                pl.BlockSpec((1, tn), lambda i, j, k: (0, j)),    # bias (f32)
            ],
            out_specs=pl.BlockSpec((tm, tn), lambda i, j, k: (i, j)),
            scratch_shapes=[pltpu.VMEM((tm, tn), jnp.float32)],
        ),
        compiler_params=pltpu.CompilerParams(
            dimension_semantics=("parallel", "parallel", "arbitrary"),
            vmem_limit_bytes=_vmem_limit_bytes(),
        ),
        cost_estimate=cost,
    )(x, w_kn, bias_row)

    return out[:m, :code_size].reshape(*lead, code_size)


def init_out2code_params(key, code_size, voc_size, dtype=jnp.float32):
    """Deterministic init mirroring the PyTorch module:
    - weight: kaiming_normal_(nonlinearity='relu')  => N(0, sqrt(2/fan_in))
    - bias:   default nn.Linear init => U(-1/sqrt(fan_in), 1/sqrt(fan_in))
    """
    kw, kb = jax.random.split(key)
    fan_in = voc_size
    std = (2.0 / fan_in) ** 0.5
    weight = std * jax.random.normal(kw, (code_size, voc_size), dtype=dtype)
    bound = 1.0 / (fan_in ** 0.5)
    bias = jax.random.uniform(kb, (code_size,), dtype=dtype,
                              minval=-bound, maxval=bound)
    return weight, bias


def prepare_out2code_params(weight, bias, *, operand_dtype=jnp.bfloat16):
    """One-time (init-time) packing: pad to tile boundaries, transpose to (K, N)
    and cast to bf16, so the jitted forward never re-materializes a padded
    weight copy in HBM."""
    code_size, voc_size = weight.shape
    tn, tk = _choose_nk_tiles(code_size, voc_size)
    n_pad = _round_up(code_size, tn)
    k_pad = _round_up(voc_size, tk)
    w_kn = jnp.pad(weight, ((0, n_pad - code_size), (0, k_pad - voc_size))).T
    w_kn = jnp.asarray(w_kn, operand_dtype)                     # (K, N) bf16
    b_row = jnp.pad(bias.astype(jnp.float32).reshape(1, code_size),
                    ((0, 0), (0, n_pad - code_size)))           # (1, N) f32
    return jax.device_put(w_kn), jax.device_put(b_row)


if __name__ == "__main__":
    # Small synthetic shapes consistent with the module:
    # opd: (batch, seq, voc_size) -> code: (batch, seq, code_size)
    batch, seq = 2, 8
    voc_size = 32      # input_size == voc_size in the original script
    code_size = 16
    hidden_size = 32   # unused by the module (kept for fidelity with the spec)

    key = jax.random.PRNGKey(0)
    k_x, k_p = jax.random.split(key)

    opd = jax.random.normal(k_x, (batch, seq, voc_size), dtype=jnp.float32)
    weight, bias = init_out2code_params(k_p, code_size, voc_size)
    w_kn, b_row = prepare_out2code_params(weight, bias)

    code = out2code_forward(opd, w_kn, b_row, code_size=code_size)
    jax.block_until_ready(code)

    # Sanity-check against plain-JAX f32 reference (bf16 operands => relaxed tol).
    ref = opd @ weight.T + bias
    assert code.shape == (batch, seq, code_size)
    assert jnp.allclose(code, ref, atol=5e-2, rtol=5e-2), (
        float(jnp.max(jnp.abs(code - ref))))

    print("KERNEL_OK")
</pallas_src>

<mosaic_0001>
module attributes {stable_mosaic.version = 11 : i64} {
  func.func @_linear_kernel(%arg0: i32, %arg1: i32, %arg2: i32, %arg3: memref<16x128xbf16, #tpu.memory_space<vmem>>, %arg4: memref<128x128xbf16, #tpu.memory_space<vmem>>, %arg5: memref<1x128xf32, #tpu.memory_space<vmem>>, %arg6: memref<16x128xf32, #tpu.memory_space<vmem>>, %arg7: memref<16x128xf32, #tpu.memory_space<vmem>>) attributes {dimension_semantics = [#tpu.dimension_semantics<parallel>, #tpu.dimension_semantics<parallel>, #tpu.dimension_semantics<arbitrary>], iteration_bounds = array<i64: 1, 1, 1>, scalar_prefetch = 0 : i64, scratch_operands = 1 : i64, tpu.core_type = #tpu.core_type<tc>, window_params = [{transform_indices = @transform_0, window_bounds = array<i64: 16, 128>}, {transform_indices = @transform_1, window_bounds = array<i64: 128, 128>}, {transform_indices = @transform_2, window_bounds = array<i64: 1, 128>}, {transform_indices = @transform_3, window_bounds = array<i64: 16, 128>}]} {
    %c0_i32 = arith.constant 0 : i32
    %0 = arith.cmpi eq, %arg2, %c0_i32 : i32
    %1 = arith.extui %0 : i1 to i32
    %c0_i32_0 = arith.constant 0 : i32
    %2 = arith.cmpi ne, %1, %c0_i32_0 : i32
    scf.if %2 {
      %cst_10 = arith.constant 0.000000e+00 : f32
      %12 = vector.broadcast %cst_10 : f32 to vector<16x128xf32>
      %c0_11 = arith.constant 0 : index
      %c0_12 = arith.constant 0 : index
      %13 = vector.load %arg7[%c0_11, %c0_12] : memref<16x128xf32, #tpu.memory_space<vmem>>, vector<16x128xf32>
      tpu.vector_store %arg7[%c0_11, %c0_12], %12 {strides = array<i32>} : memref<16x128xf32, #tpu.memory_space<vmem>>, vector<16x128xf32>,
    } else {
    }
    %c0 = arith.constant 0 : index
    %c0_1 = arith.constant 0 : index
    %3 = vector.load %arg7[%c0, %c0_1] : memref<16x128xf32, #tpu.memory_space<vmem>>, vector<16x128xf32>
    %c0_2 = arith.constant 0 : index
    %c0_3 = arith.constant 0 : index
    %4 = vector.load %arg3[%c0_2, %c0_3] : memref<16x128xbf16, #tpu.memory_space<vmem>>, vector<16x128xbf16>
    %c0_4 = arith.constant 0 : index
    %c0_5 = arith.constant 0 : index
    %5 = vector.load %arg4[%c0_4, %c0_5] : memref<128x128xbf16, #tpu.memory_space<vmem>>, vector<128x128xbf16>
    %cst = arith.constant dense<0.000000e+00> : vector<16x128xf32>
    %6 = tpu.matmul %4, %5, %cst {dimension_numbers = #tpu.dot_dimension_numbers<[1], [0], [0], [1], [0, 0, 1, 1], [], []>} : vector<16x128xbf16>, vector<128x128xbf16>, vector<16x128xf32> -> vector<16x128xf32>
    %7 = arith.addf %3, %6 : vector<16x128xf32>
    %c0_6 = arith.constant 0 : index
    %c0_7 = arith.constant 0 : index
    %8 = vector.load %arg7[%c0_6, %c0_7] : memref<16x128xf32, #tpu.memory_space<vmem>>, vector<16x128xf32>
    tpu.vector_store %arg7[%c0_6, %c0_7], %7 {strides = array<i32>} : memref<16x128xf32, #tpu.memory_space<vmem>>, vector<16x128xf32>,
    %c0_i32_8 = arith.constant 0 : i32
    %9 = arith.cmpi eq, %arg2, %c0_i32_8 : i32
    %10 = arith.extui %9 : i1 to i32
    %c0_i32_9 = arith.constant 0 : i32
    %11 = arith.cmpi ne, %10, %c0_i32_9 : i32
    scf.if %11 {
      %c0_10 = arith.constant 0 : index
      %c0_11 = arith.constant 0 : index
      %12 = vector.load %arg7[%c0_10, %c0_11] : memref<16x128xf32, #tpu.memory_space<vmem>>, vector<16x128xf32>
      %c0_12 = arith.constant 0 : index
      %c0_13 = arith.constant 0 : index
      %13 = vector.load %arg5[%c0_12, %c0_13] : memref<1x128xf32, #tpu.memory_space<vmem>>, vector<1x128xf32>
      %14 = vector.broadcast %13 : vector<1x128xf32> to vector<16x128xf32>
      %15 = arith.addf %12, %14 : vector<16x128xf32>
      %c0_14 = arith.constant 0 : index
      %c0_15 = arith.constant 0 : index
      %16 = vector.load %arg6[%c0_14, %c0_15] : memref<16x128xf32, #tpu.memory_space<vmem>>, vector<16x128xf32>
      tpu.vector_store %arg6[%c0_14, %c0_15], %15 {strides = array<i32>} : memref<16x128xf32, #tpu.memory_space<vmem>>, vector<16x128xf32>,
    } else {
    }
    return
  }
  func.func @transform_0(%arg0: i32, %arg1: i32, %arg2: i32) -> (i32, i32) {
    %c0_i32 = arith.constant 0 : i32
    return %arg0, %arg2 : i32, i32
  }
  func.func @transform_1(%arg0: i32, %arg1: i32, %arg2: i32) -> (i32, i32) {
    %c0_i32 = arith.constant 0 : i32
    return %arg2, %arg1 : i32, i32
  }
  func.func @transform_2(%arg0: i32, %arg1: i32, %arg2: i32) -> (i32, i32) {
    %c0_i32 = arith.constant 0 : i32
    %c0_i32_0 = arith.constant 0 : i32
    return %c0_i32, %arg1 : i32, i32
  }
  func.func @transform_3(%arg0: i32, %arg1: i32, %arg2: i32) -> (i32, i32) {
    %c0_i32 = arith.constant 0 : i32
    return %arg0, %arg1 : i32, i32
  }
}

</mosaic_0001>

<bundles_post_ra>
// kernel: out2code_forward.1
= control target key start
LH: loop header
LB: loop body
LE: loop exit
PB: predicated region body
PF: predicated region fallthrough
CT: control target
= control target key end

     0   :  { %8 = vsyncpa [#allocation4], 0  ;;  %s252_s12 = smov [#allocation3]   ;;  %s301_s0 = inlined_call_operand.vmem [shape: bf16[16,128], index: 0, kind: input, shape index: {}]   ;;  %s302_s1 = inlined_call_operand.hbm [shape: bf16[128,128], index: 1, kind: input, shape index: {}]   ;;  %s303_s2 = inlined_call_operand.vmem [shape: f32[1,128], index: 2, kind: input, shape index: {}]   ;;  %s304_s3 = inlined_call_operand.vmem [shape: f32[16,128], index: 3, kind: output, shape index: {}]  }
   0x1   :  { %s16_s13 = sshll.u32 %s252_s12, 4  ;;  %s228_s16 = scalar_lea.hbm %s302_s1, 1024  ;;  %s17_s13 = int_to_ptr.vmem [resolvable:$true] %s16_s13 }
   0x2   :  { %p229_p0 = scmp.ne.s32.totalorder %s302_s1, %s228_s16  ;;  %p232_p1 = scmp.lt.u32.totalorder %s228_s16, %s302_s1 }
   0x4   :  { %p234_p2 = pnand %p232_p1, %p229_p0 }
   0x6   :  { %237 = shalt.err (!%p234_p2)
}
   0x7   :  { %s238_s21 = scalar_lea.vmem %s17_s13, 1024  ;;  %p243_p4 = scmp.lt.s32.totalorder %s17_s13, %s17_s13 }
   0x8   :  { %p239_p3 = scmp.ne.s32.totalorder %s17_s13, %s238_s21  ;;  %p244_p5 = scmp.lt.s32.totalorder %s238_s21, %s238_s21 }
   0xa   :  { %p245_p6 = por %p244_p5, %p243_p4 }
   0xc   :  { %p246_p7 = pnand %p245_p6, %p239_p3 }
   0xe   :  { %249 = shalt.err (!%p246_p7)
}
   0xf   :  { %s253_s22 = smov 64   ;;  %s254_s23 = smov 4  }
  0x10   :  { %22 = dma.hbm_to_vmem [thread:$0]  %s302_s1, 1024, %s17_s13, [#allocation4], %s253_s22, %s253_s22, %s254_s23  }
  0x11   :  { %250 = dma.done.wait [#allocation4], 1024  }
  0x12   :  { %251 = vsyncadd [#allocation4], 4294966272  ;;  %v255_v0 = vmov 0.0   ;;  %vm256_vm0 = vmmov 0   ;;  %v219_v1 = vld [vmem:[#allocation3] sm:$0xff]   ;;  %v220_v2 = vld [vmem:[#allocation3 + $0x8] sm:$0xff]  }
  0x13   :  { %194 = vmatprep.subr.bf16.mxu0 %v255_v0  ;;  %210 = vmatprep.mubr.msk.bf16.mxu0 %vm256_vm0, %v255_v0  ;;  %v221_v3 = vld [vmem:[#allocation3 + $0x10] sm:$0xff]   ;;  %v222_v4 = vld [vmem:[#allocation3 + $0x18] sm:$0xff]   ;;  %v223_v5 = vld [vmem:[#allocation3 + $0x20] sm:$0xff]  }
  0x14   :  { %195 = vmatpush3.bf16.msra.mxu0 %v219_v1  ;;  %v224_v6 = vld [vmem:[#allocation3 + $0x28] sm:$0xff]   ;;  %v225_v7 = vld [vmem:[#allocation3 + $0x30] sm:$0xff]   ;;  %v226_v8 = vld [vmem:[#allocation3 + $0x38] sm:$0xff]  }
  0x15   :  { %196 = vmatprep.subr.bf16.mxu0 %v255_v0  ;;  %v227_v9 = vld [vmem:[%s301_s0] sm:$0xff]  }
  0x16   :  { %v184_v10 = vld [vmem:[%s303_s2] ss:$0 sm:$0xff] }
  0x18   :  { %197 = vmatpush3.bf16.msra.mxu0 %v220_v2 }
  0x19   :  { %198 = vmatprep.subr.bf16.mxu0 %v255_v0 }
  0x1c   :  { %199 = vmatpush3.bf16.msra.mxu0 %v221_v3 }
  0x1d   :  { %200 = vmatprep.subr.bf16.mxu0 %v255_v0 }
  0x20   :  { %201 = vmatpush3.bf16.msra.mxu0 %v222_v4 }
  0x21   :  { %202 = vmatprep.subr.bf16.mxu0 %v255_v0 }
  0x24   :  { %203 = vmatpush3.bf16.msra.mxu0 %v223_v5 }
  0x25   :  { %204 = vmatprep.subr.bf16.mxu0 %v255_v0 }
  0x28   :  { %205 = vmatpush3.bf16.msra.mxu0 %v224_v6 }
  0x29   :  { %206 = vmatprep.subr.bf16.mxu0 %v255_v0 }
  0x2c   :  { %207 = vmatpush3.bf16.msra.mxu0 %v225_v7 }
  0x2d   :  { %208 = vmatprep.subr.bf16.mxu0 %v255_v0 }
  0x30   :  { %209 = vmatpush3.bf16.msra.mxu0 %v226_v8 }
  0x33   :  { %211 = vmatmul.mubr.bf16.vlgmr.msra.gmra.mrb[0].mxu0 %v227_v9 }
 0x106   :  { %v143_v11 = vpop.f32.mrb[0].mxu0 }
 0x107   :  { %v166_v12 = vadd.f32 %v184_v10, %v143_v11  ;;  %v212_v13 = vpop.f32.mrb[1].mxu0 }
 0x108   :  { %v146_v14 = vpop.f32.mrb[2].mxu0 }
 0x109   :  { %168 = vst [vmem:[%s304_s3] sm:$0xff] %v166_v12  ;;  %v167_v15 = vadd.f32 %v184_v10, %v146_v14  ;;  %v213_v16 = vpop.f32.mrb[3].mxu0 }
 0x10b   :  { %169 = vst [vmem:[%s304_s3 + $0x8] sm:$0xff] %v167_v15 }
 0x10c   :  { %174 = vsyncpa [#allocation4], 1 }

</bundles_post_ra>
